<compile_context>
chip_gen: v7x
topology: tpu7x:2x2x1
jax: 0.10.0
libtpu: 0.0.40
codegen_flags: <defaults>
</compile_context>

<pallas_src>
import jax
import jax.numpy as jnp
from jax.experimental import pallas as pl
from jax.experimental.pallas import tpu as pltpu

SUBLANE = 8
MAX_TM = 8192  # row clamp per grid step


def _round_up(n, m):
    return ((n + m - 1) // m) * m


def _cdiv(a, b):
    return -(-a // b)


def mlp_kernel(x_ref, w1_ref, b1_ref, w2_ref, b2_ref, w3_ref, b3_ref, o_ref):
    """One batch tile of Linear->ReLU->Linear->ReLU->Linear.

    x tile arrives f32 (single HBM read, no wrapper copy) and is cast to bf16
    only as an MXU operand; every matmul accumulates in f32 on the MXU; bias
    add and ReLU run in f32 on the VPU.
    """
    x = x_ref[...].astype(jnp.bfloat16)                               # (TM, in)
    # layer 1: Linear(in, 64) + ReLU
    h1 = jnp.dot(x, w1_ref[...], preferred_element_type=jnp.float32) + b1_ref[...]
    h1 = jnp.maximum(h1, 0.0)
    # layer 2: Linear(64, 32) + ReLU
    h2 = jnp.dot(h1.astype(jnp.bfloat16), w2_ref[...],
                 preferred_element_type=jnp.float32) + b2_ref[...]
    h2 = jnp.maximum(h2, 0.0)
    # layer 3: Linear(32, out)
    out = jnp.dot(h2.astype(jnp.bfloat16), w3_ref[...],
                  preferred_element_type=jnp.float32) + b3_ref[...]
    o_ref[...] = out.astype(o_ref.dtype)


def _vmem_capacity_bytes():
    """Physical VMEM of the current chip; conservative (v7x per-TC) fallback."""
    try:
        info = pltpu.get_tpu_info()
        v = getattr(info, "vmem_capacity_bytes", None)
        if v:
            return int(v)
    except Exception:
        pass
    return 64 << 20


def _choose_tiling(batch, in_dim, h1_dim, h2_dim, out_dim, vmem_bytes):
    """Pick (tm, grid_steps, batch_pad).

    batch is padded to a multiple of 8 plus at most ~8*(g-1) extra rows so the
    tile evenly divides the grid (avoids relying on ragged-edge OOB masking and
    avoids the old round-up-to-tm waste). Tile budget ~1/3 of physical VMEM so
    a v5e/v6e-sized choice can't OOM v7x's 64 MiB.
    """
    batch_p8 = _round_up(max(batch, 1), SUBLANE)
    budget = min(vmem_bytes // 3, 40 << 20)
    # per-row VMEM footprint: double-buffered f32 x, double-buffered f32 out,
    # bf16 cast of x, f32+bf16 intermediates, final f32 result; 1.5x slack.
    per_row = (2 * in_dim * 4 + in_dim * 2
               + 2 * out_dim * 4 + out_dim * 4
               + h1_dim * (4 + 2) + h2_dim * (4 + 2))
    per_row = int(per_row * 1.5) + 1
    desired = (budget // per_row // SUBLANE) * SUBLANE
    desired = max(SUBLANE, min(MAX_TM, desired))

    g = max(1, _cdiv(batch_p8, desired))
    if batch_p8 >= 2 * SUBLANE:
        # >=2 grid steps so ("parallel",) lets v7x's two TensorCores split the
        # batch; costs one ~0.35us extra step on v5e/v6e (negligible).
        g = max(g, 2)
    tm = _round_up(_cdiv(batch_p8, g), SUBLANE)
    batch_pad = g * tm
    return tm, g, batch_pad


def simple_nn_forward(x, params):
    """x: [batch, input_dim] float32.
    params: w{1,2,3} of shape (in, out) (transposed vs. PyTorch), b{1,2,3} of
    shape (1, out); computes y = relu(relu(x@w1+b1)@w2+b2)@w3+b3."""
    w1, b1 = params["w1"], params["b1"]
    w2, b2 = params["w2"], params["b2"]
    w3, b3 = params["w3"], params["b3"]

    batch, in_dim = x.shape
    h1_dim, h2_dim, out_dim = w1.shape[1], w2.shape[1], w3.shape[1]

    vmem = _vmem_capacity_bytes()
    tm, g, batch_pad = _choose_tiling(batch, in_dim, h1_dim, h2_dim, out_dim, vmem)
    # generation-aware scoped-VMEM limit: ~48 MiB on v7x, ~96 MiB on v5e/v6e.
    vmem_limit = int(max(32 << 20, min(int(vmem * 0.75), 96 << 20)))

    # Only pad batch rows (by at most a few multiples of 8); no lane padding,
    # no dtype copy of x in the wrapper.
    xp = x
    if batch_pad != batch:
        xp = jnp.zeros((batch_pad, in_dim), x.dtype).at[:batch, :].set(x)

    # Tiny, grid-invariant weights: bf16 MXU operands; biases stay f32.
    w1b = w1.astype(jnp.bfloat16)
    w2b = w2.astype(jnp.bfloat16)
    w3b = w3.astype(jnp.bfloat16)
    b1f = b1.reshape(1, -1).astype(jnp.float32)
    b2f = b2.reshape(1, -1).astype(jnp.float32)
    b3f = b3.reshape(1, -1).astype(jnp.float32)

    # Cost hints from true (unpadded) sizes.
    flops = 2 * batch * (in_dim * h1_dim + h1_dim * h2_dim + h2_dim * out_dim) \
        + batch * (2 * h1_dim + 2 * h2_dim + out_dim)
    bytes_accessed = (xp.size * 4
                      + (w1b.size + w2b.size + w3b.size) * 2
                      + (b1f.size + b2f.size + b3f.size) * 4
                      + batch_pad * out_dim * 4)

    out_padded = pl.pallas_call(
        mlp_kernel,
        out_shape=jax.ShapeDtypeStruct((batch_pad, out_dim), jnp.float32),
        grid=(g,),
        in_specs=[
            pl.BlockSpec((tm, in_dim), lambda i: (i, 0)),       # x: batch-tiled
            pl.BlockSpec((in_dim, h1_dim), lambda i: (0, 0)),   # weights/biases:
            pl.BlockSpec((1, h1_dim), lambda i: (0, 0)),        # resident across
            pl.BlockSpec((h1_dim, h2_dim), lambda i: (0, 0)),   # all grid steps
            pl.BlockSpec((1, h2_dim), lambda i: (0, 0)),
            pl.BlockSpec((h2_dim, out_dim), lambda i: (0, 0)),
            pl.BlockSpec((1, out_dim), lambda i: (0, 0)),
        ],
        out_specs=pl.BlockSpec((tm, out_dim), lambda i: (i, 0)),
        compiler_params=pltpu.CompilerParams(
            dimension_semantics=("parallel",),   # batch tiles -> both TCs on v7x
            vmem_limit_bytes=vmem_limit,
        ),
        cost_estimate=pl.CostEstimate(
            flops=flops, transcendentals=0, bytes_accessed=bytes_accessed),
    )(xp, w1b, b1f, w2b, b2f, w3b, b3f)

    if batch_pad != batch:
        return out_padded[:batch, :]
    return out_padded


def init_params(key, input_dim, output_dim):
    """Deterministic init mimicking PyTorch nn.Linear default (uniform +-1/sqrt(fan_in))."""
    dims = [(input_dim, 64), (64, 32), (32, output_dim)]
    params = {}
    keys = jax.random.split(key, 2 * len(dims))
    for i, (fan_in, fan_out) in enumerate(dims):
        bound = 1.0 / (fan_in ** 0.5)
        params[f"w{i + 1}"] = jax.random.uniform(
            keys[2 * i], (fan_in, fan_out), minval=-bound, maxval=bound,
            dtype=jnp.float32)
        params[f"b{i + 1}"] = jax.random.uniform(
            keys[2 * i + 1], (1, fan_out), minval=-bound, maxval=bound,
            dtype=jnp.float32)
    return params


if __name__ == "__main__":
    key = jax.random.PRNGKey(0)
    k_x, k_p = jax.random.split(key)

    batch, input_dim, output_dim = 8, 32, 16
    x = jax.random.normal(k_x, (batch, input_dim), dtype=jnp.float32)
    params = init_params(k_p, input_dim, output_dim)

    out = simple_nn_forward(x, params)
    jax.block_until_ready(out)
    assert out.shape == (batch, output_dim)

    # Reference with matching bf16 operand rounding + f32 accumulation
    # (mirrors the kernel's MXU path; same math as the PyTorch forward).
    bf = jnp.bfloat16
    h = jnp.maximum(jnp.dot(x.astype(bf), params["w1"].astype(bf),
                            preferred_element_type=jnp.float32) + params["b1"], 0.0)
    h = jnp.maximum(jnp.dot(h.astype(bf), params["w2"].astype(bf),
                            preferred_element_type=jnp.float32) + params["b2"], 0.0)
    ref = jnp.dot(h.astype(bf), params["w3"].astype(bf),
                  preferred_element_type=jnp.float32) + params["b3"]

    assert jnp.allclose(out, ref, atol=1e-2, rtol=1e-2), \
        float(jnp.max(jnp.abs(out - ref)))

    print("KERNEL_OK")
</pallas_src>

<mosaic_0001>
module attributes {stable_mosaic.version = 11 : i64} {
  func.func @mlp_kernel(%arg0: i32, %arg1: memref<8x32xf32, #tpu.memory_space<vmem>>, %arg2: memref<32x64xbf16, #tpu.memory_space<vmem>>, %arg3: memref<1x64xf32, #tpu.memory_space<vmem>>, %arg4: memref<64x32xbf16, #tpu.memory_space<vmem>>, %arg5: memref<1x32xf32, #tpu.memory_space<vmem>>, %arg6: memref<32x16xbf16, #tpu.memory_space<vmem>>, %arg7: memref<1x16xf32, #tpu.memory_space<vmem>>, %arg8: memref<8x16xf32, #tpu.memory_space<vmem>>) attributes {dimension_semantics = [#tpu.dimension_semantics<parallel>], iteration_bounds = array<i64: 1>, scalar_prefetch = 0 : i64, scratch_operands = 0 : i64, tpu.core_type = #tpu.core_type<tc>, window_params = [{transform_indices = @transform_0, window_bounds = array<i64: 8, 32>}, {pipeline_mode = #tpu.pipeline_mode<synchronous>, transform_indices = @transform_1, window_bounds = array<i64: 32, 64>}, {pipeline_mode = #tpu.pipeline_mode<synchronous>, transform_indices = @transform_2, window_bounds = array<i64: 1, 64>}, {pipeline_mode = #tpu.pipeline_mode<synchronous>, transform_indices = @transform_3, window_bounds = array<i64: 64, 32>}, {pipeline_mode = #tpu.pipeline_mode<synchronous>, transform_indices = @transform_4, window_bounds = array<i64: 1, 32>}, {pipeline_mode = #tpu.pipeline_mode<synchronous>, transform_indices = @transform_5, window_bounds = array<i64: 32, 16>}, {pipeline_mode = #tpu.pipeline_mode<synchronous>, transform_indices = @transform_6, window_bounds = array<i64: 1, 16>}, {transform_indices = @transform_7, window_bounds = array<i64: 8, 16>}]} {
    %c0 = arith.constant 0 : index
    %c0_0 = arith.constant 0 : index
    %0 = vector.load %arg1[%c0, %c0_0] : memref<8x32xf32, #tpu.memory_space<vmem>>, vector<8x32xf32>
    %1 = arith.truncf %0 : vector<8x32xf32> to vector<8x32xbf16>
    %c0_1 = arith.constant 0 : index
    %c0_2 = arith.constant 0 : index
    %2 = vector.load %arg2[%c0_1, %c0_2] : memref<32x64xbf16, #tpu.memory_space<vmem>>, vector<32x64xbf16>
    %cst = arith.constant dense<0.000000e+00> : vector<8x64xf32>
    %3 = tpu.matmul %1, %2, %cst {dimension_numbers = #tpu.dot_dimension_numbers<[1], [0], [0], [1], [0, 0, 1, 1], [], []>} : vector<8x32xbf16>, vector<32x64xbf16>, vector<8x64xf32> -> vector<8x64xf32>
    %c0_3 = arith.constant 0 : index
    %c0_4 = arith.constant 0 : index
    %4 = vector.load %arg3[%c0_3, %c0_4] : memref<1x64xf32, #tpu.memory_space<vmem>>, vector<1x64xf32>
    %5 = vector.broadcast %4 : vector<1x64xf32> to vector<8x64xf32>
    %6 = arith.addf %3, %5 : vector<8x64xf32>
    %cst_5 = arith.constant 0.000000e+00 : f32
    %7 = vector.broadcast %cst_5 : f32 to vector<8x64xf32>
    %8 = arith.maximumf %6, %7 : vector<8x64xf32>
    %9 = arith.truncf %8 : vector<8x64xf32> to vector<8x64xbf16>
    %c0_6 = arith.constant 0 : index
    %c0_7 = arith.constant 0 : index
    %10 = vector.load %arg4[%c0_6, %c0_7] : memref<64x32xbf16, #tpu.memory_space<vmem>>, vector<64x32xbf16>
    %cst_8 = arith.constant dense<0.000000e+00> : vector<8x32xf32>
    %11 = tpu.matmul %9, %10, %cst_8 {dimension_numbers = #tpu.dot_dimension_numbers<[1], [0], [0], [1], [0, 0, 1, 1], [], []>} : vector<8x64xbf16>, vector<64x32xbf16>, vector<8x32xf32> -> vector<8x32xf32>
    %c0_9 = arith.constant 0 : index
    %c0_10 = arith.constant 0 : index
    %12 = vector.load %arg5[%c0_9, %c0_10] : memref<1x32xf32, #tpu.memory_space<vmem>>, vector<1x32xf32>
    %13 = vector.broadcast %12 : vector<1x32xf32> to vector<8x32xf32>
    %14 = arith.addf %11, %13 : vector<8x32xf32>
    %cst_11 = arith.constant 0.000000e+00 : f32
    %15 = vector.broadcast %cst_11 : f32 to vector<8x32xf32>
    %16 = arith.maximumf %14, %15 : vector<8x32xf32>
    %17 = arith.truncf %16 : vector<8x32xf32> to vector<8x32xbf16>
    %c0_12 = arith.constant 0 : index
    %c0_13 = arith.constant 0 : index
    %18 = vector.load %arg6[%c0_12, %c0_13] : memref<32x16xbf16, #tpu.memory_space<vmem>>, vector<32x16xbf16>
    %cst_14 = arith.constant dense<0.000000e+00> : vector<8x16xf32>
    %19 = tpu.matmul %17, %18, %cst_14 {dimension_numbers = #tpu.dot_dimension_numbers<[1], [0], [0], [1], [0, 0, 1, 1], [], []>} : vector<8x32xbf16>, vector<32x16xbf16>, vector<8x16xf32> -> vector<8x16xf32>
    %c0_15 = arith.constant 0 : index
    %c0_16 = arith.constant 0 : index
    %20 = vector.load %arg7[%c0_15, %c0_16] : memref<1x16xf32, #tpu.memory_space<vmem>>, vector<1x16xf32>
    %21 = vector.broadcast %20 : vector<1x16xf32> to vector<8x16xf32>
    %22 = arith.addf %19, %21 : vector<8x16xf32>
    %c0_17 = arith.constant 0 : index
    %c0_18 = arith.constant 0 : index
    %23 = vector.load %arg8[%c0_17, %c0_18] : memref<8x16xf32, #tpu.memory_space<vmem>>, vector<8x16xf32>
    tpu.vector_store %arg8[%c0_17, %c0_18], %22 {strides = array<i32>} : memref<8x16xf32, #tpu.memory_space<vmem>>, vector<8x16xf32>,
    return
  }
  func.func @transform_0(%arg0: i32) -> (i32, i32) {
    %c0_i32 = arith.constant 0 : i32
    %c0_i32_0 = arith.constant 0 : i32
    return %arg0, %c0_i32 : i32, i32
  }
  func.func @transform_1(%arg0: i32) -> (i32, i32) {
    %c0_i32 = arith.constant 0 : i32
    %c0_i32_0 = arith.constant 0 : i32
    %c0_i32_1 = arith.constant 0 : i32
    return %c0_i32, %c0_i32_0 : i32, i32
  }
  func.func @transform_2(%arg0: i32) -> (i32, i32) {
    %c0_i32 = arith.constant 0 : i32
    %c0_i32_0 = arith.constant 0 : i32
    %c0_i32_1 = arith.constant 0 : i32
    return %c0_i32, %c0_i32_0 : i32, i32
  }
  func.func @transform_3(%arg0: i32) -> (i32, i32) {
    %c0_i32 = arith.constant 0 : i32
    %c0_i32_0 = arith.constant 0 : i32
    %c0_i32_1 = arith.constant 0 : i32
    return %c0_i32, %c0_i32_0 : i32, i32
  }
  func.func @transform_4(%arg0: i32) -> (i32, i32) {
    %c0_i32 = arith.constant 0 : i32
    %c0_i32_0 = arith.constant 0 : i32
    %c0_i32_1 = arith.constant 0 : i32
    return %c0_i32, %c0_i32_0 : i32, i32
  }
  func.func @transform_5(%arg0: i32) -> (i32, i32) {
    %c0_i32 = arith.constant 0 : i32
    %c0_i32_0 = arith.constant 0 : i32
    %c0_i32_1 = arith.constant 0 : i32
    return %c0_i32, %c0_i32_0 : i32, i32
  }
  func.func @transform_6(%arg0: i32) -> (i32, i32) {
    %c0_i32 = arith.constant 0 : i32
    %c0_i32_0 = arith.constant 0 : i32
    %c0_i32_1 = arith.constant 0 : i32
    return %c0_i32, %c0_i32_0 : i32, i32
  }
  func.func @transform_7(%arg0: i32) -> (i32, i32) {
    %c0_i32 = arith.constant 0 : i32
    %c0_i32_0 = arith.constant 0 : i32
    return %arg0, %c0_i32 : i32, i32
  }
}

</mosaic_0001>

<bundles_post_ra>
// kernel: tpu_custom_call.1
= control target key start
LH: loop header
LB: loop body
LE: loop exit
PB: predicated region body
PF: predicated region fallthrough
CT: control target
= control target key end

     0   :  { %v354_v1 = vmov 0.0   ;;  %vm355_vm0 = vmmov 0   ;;  %vm53_vm1 = vcmask 261120   ;;  %s450_s0 = inlined_call_operand.vmem [shape: f32[8,32], index: 0, kind: input, shape index: {}]   ;;  %s451_s1 = inlined_call_operand.vmem [shape: bf16[32,64], index: 1, kind: input, shape index: {}]   ;;  %s452_s2 = inlined_call_operand.vmem [shape: f32[1,64], index: 2, kind: input, shape index: {}]   ;;  %s453_s3 = inlined_call_operand.vmem [shape: bf16[64,32], index: 3, kind: input, shape index: {}]   ;;  %s454_s4 = inlined_call_operand.vmem [shape: f32[1,32], index: 4, kind: input, shape index: {}]   ;;  %s455_s5 = inlined_call_operand.vmem [shape: bf16[32,16], index: 5, kind: input, shape index: {}]   ;;  %s456_s6 = inlined_call_operand.vmem [shape: f32[1,16], index: 6, kind: input, shape index: {}]   ;;  %s457_s7 = inlined_call_operand.hbm [shape: f32[8,16], index: 7, kind: output, shape index: {}]  }
   0x1   :  { %v322_v0 = vld [vmem:[%s451_s1] sm:$0xff]   ;;  %291 = vmatprep.subr.bf16.mxu0 %v354_v1  ;;  %v323_v2 = vld [vmem:[%s451_s1 + $0x8] sm:$0xff]   ;;  %299 = vmatprep.subr.bf16.mxu1 %v354_v1 }
   0x2   :  { %292 = vmatpush3.bf16.msra.mxu0 %v322_v0  ;;  %295 = vmatprep.mubr.msk.bf16.mxu0 %vm355_vm0, %v354_v1  ;;  %v28_v3 = vld [vmem:[%s450_s0] sm:$0xff]  ;;  %v325_v5 = vld [vmem:[%s453_s3 + $0x8] sm:$0xff]  }
   0x3   :  { %293 = vmatprep.subr.bf16.mxu0 %v354_v1  ;;  %v324_v4 = vld [vmem:[%s453_s3] sm:$0xff]   ;;  %307 = vmatprep.mubr.msk.bf16.mxu1 %vm355_vm0, %v354_v1  ;;  %v29_v6 = vpack.c.bf16 %v28_v3, %v28_v3 }
   0x4   :  { %300 = vmatpush3.bf16.msra.mxu1 %v324_v4 }
   0x5   :  { %301 = vmatprep.subr.bf16.mxu1 %v354_v1 }
   0x6   :  { %294 = vmatpush3.bf16.msra.mxu0 %v323_v2 }
   0x7   :  { %311 = vmatprep.subr.bf16.mxu0 %v354_v1 }
   0x8   :  { %12 = vsyncpa [#allocation3], 0  ;;  %302 = vmatpush3.bf16.msra.mxu1 %v325_v5  ;;  %v326_v7 = vld [vmem:[%s453_s3 + $0x10] sm:$0xff]   ;;  %v327_v8 = vld [vmem:[%s453_s3 + $0x18] sm:$0xff]   ;;  %vm138_vm2 = vcmask 523264   ;;  %s356_s21 = smov [#allocation2]  }
   0x9   :  { %296 = vmatmul.mubr.msk.bf16.vlgmr.msra.gmra.mrb[0].mxu0 %vm53_vm1, %v29_v6  ;;  %303 = vmatprep.subr.bf16.mxu1 %v354_v1  ;;  %v328_v9 = vld [vmem:[%s455_s5] sm:$0xff]   ;;  %v329_v18 = vld [vmem:[%s455_s5 + $0x8] sm:$0xff]   ;;  %s258_s5 = sshll.u32 %s356_s21, 4  ;;  %vm250_vm3 = vcmask 130048   ;;  %s259_s5 = int_to_ptr.vmem [resolvable:$true] %s258_s5 }
   0xa   :  { %315 = vmatprep.mubr.msk.bf16.mxu0 %vm355_vm0, %v354_v1  ;;  %312 = vmatpush3.bf16.msra.mxu0 %v328_v9  ;;  %v266_v10 = vld [vmem:[%s452_s2] ss:$0 sm:$0xff]  ;;  %p335_p1 = scmp.lt.s32.totalorder %s259_s5, %s259_s5 }
   0xb   :  { %313 = vmatprep.subr.bf16.mxu0 %v354_v1  ;;  %v270_v19 = vld [vmem:[%s454_s4] ss:$0 sm:$0xff]  ;;  %s330_s4 = scalar_lea.vmem %s259_s5, 128 }
   0xc   :  { %304 = vmatpush3.bf16.msra.mxu1 %v326_v7  ;;  %v276_v27 = vld [vmem:[%s456_s6] ss:$0 sm:$0xff]  ;;  %p331_p0 = scmp.ne.s32.totalorder %s259_s5, %s330_s4  ;;  %p336_p2 = scmp.lt.s32.totalorder %s330_s4, %s330_s4 }
   0xd   :  { %305 = vmatprep.subr.bf16.mxu1 %v354_v1 }
   0xe   :  { %314 = vmatpush3.bf16.msra.mxu0 %v329_v18  ;;  %p337_p3 = por %p336_p2, %p335_p1 }
  0x10   :  { %306 = vmatpush3.bf16.msra.mxu1 %v327_v8  ;;  %p338_p4 = pnand %p337_p3, %p331_p0 }
  0xdc   :  { %v91_v11 = vpop.f32.mrb[0].mxu0 }
  0xdd   :  { %v92_v12 = vadd.f32 %v266_v10, %v91_v11  ;;  %v297_v13 = vpop.f32.mrb[1].mxu0 }
  0xde   :  { %v94_v14 = vpop.f32.mrb[2].mxu0 }
  0xdf   :  { %v97_v15 = vmax.f32 %v92_v12, 0.0  ;;  %v298_v16 = vpop.f32.mrb[3].mxu0 }
  0xe1   :  { %v98_v17 = vpack.c.bf16 %v97_v15, %v97_v15 }
  0xe3   :  { %308 = vmatmul.mubr.msk.bf16.vlgmr.msra.gmra.mrb[0].mxu1 %vm138_vm2, %v98_v17 }
 0x1b6   :  { %v176_v20 = vpop.f32.mrb[0].mxu1 }
 0x1b7   :  { %v177_v21 = vadd.f32 %v270_v19, %v176_v20  ;;  %v309_v22 = vpop.f32.mrb[1].mxu1 }
 0x1b8   :  { %v179_v23 = vpop.f32.mrb[2].mxu1 }
 0x1b9   :  { %v182_v24 = vmax.f32 %v177_v21, 0.0  ;;  %v310_v25 = vpop.f32.mrb[3].mxu1 }
 0x1bb   :  { %v183_v26 = vpack.c.bf16 %v182_v24, %v182_v24 }
 0x1bd   :  { %316 = vmatmul.mubr.msk.bf16.vlgmr.msra.gmra.mrb[4].mxu0 %vm53_vm1, %v183_v26 }
 0x290   :  { %v244_v28 = vpop.f32.mrb[4].mxu0 }
 0x291   :  { %v245_v29 = vadd.f32 %v276_v27, %v244_v28  ;;  %v317_v30 = vpop.f32.mrb[5].mxu0 }
 0x292   :  { %v247_v31 = vpop.f32.mrb[6].mxu0 }
 0x293   :  { %v318_v32 = vpop.f32.mrb[7].mxu0  ;;  %251 = vst.msk [vmem:[#allocation2] sm:$0xff] %vm250_vm3, %v245_v29 }
 0x294   :  { %341 = shalt.err (!%p338_p4)
}
 0x295   :  { %s342_s6 = scalar_lea.hbm %s457_s7, 128 }
 0x296   :  { %p343_p5 = scmp.ne.s32.totalorder %s457_s7, %s342_s6  ;;  %p346_p6 = scmp.lt.u32.totalorder %s342_s6, %s457_s7 }
 0x298   :  { %p348_p7 = pnand %p346_p6, %p343_p5 }
 0x29a   :  { %351 = shalt.err (!%p348_p7)
}
 0x29b   :  { %261 = dma.vmem_to_hbm [thread:$0]  %s259_s5, 128, %s457_s7, [#allocation3]  }
 0x29c   :  { %352 = dma.done.wait [#allocation3], 128  }
 0x29d   :  { %353 = vsyncadd [#allocation3], 4294967168 }
 0x29e   :  { %265 = vsyncpa [#allocation3], 1 }

</bundles_post_ra>
